<compile_context>
chip_gen: v6e
topology: v6e:2x2x1
jax: 0.10.0
libtpu: 0.0.40
codegen_flags: <defaults>
</compile_context>

<pallas_src>
import jax
import jax.numpy as jnp
from jax.experimental import pallas as pl
from jax.experimental.pallas import tpu as pltpu  # noqa: F401  (TPU tuning hooks)

# ---------------- problem sizes (small, consistent with the module) -----------
N = 32            # number of graph nodes
IN_FEATURE = 16
HIDDEN = 32
OUT_FEATURE = 8
DROPOUT_P = 0.5

# keep an element iff its uniform uint32 draw >= p * 2^32
_KEEP_THRESHOLD = int(DROPOUT_P * (1 << 32))        # python int, cast in-kernel
_INV_KEEP = 1.0 / (1.0 - DROPOUT_P)


def gcn_kernel(x_ref, adj_ref, w1_ref, b1_ref, w2_ref, b2_ref, bits_ref, out_ref):
    x = x_ref[...].astype(jnp.float32)
    adj = adj_ref[...].astype(jnp.float32)

    # ---- GCN layer 1: adj @ (x @ W1) + b1 ------------------------------------
    support1 = jnp.dot(x, w1_ref[...], preferred_element_type=jnp.float32)
    h1 = jnp.dot(adj, support1, preferred_element_type=jnp.float32) + b1_ref[...]

    # ---- relu(dropout(h1, p, training=True)) as one fused select -------------
    # Since the dropout scale 1/(1-p) is positive,
    #   relu(dropout(x)) == where(keep & (x > 0), x / (1-p), 0)
    keep = bits_ref[...] >= jnp.uint32(_KEEP_THRESHOLD)
    h1 = jnp.where(jnp.logical_and(keep, h1 > 0.0), h1 * _INV_KEEP, 0.0)

    # ---- GCN layer 2: adj @ (h1 @ W2) + b2 ------------------------------------
    support2 = jnp.dot(h1, w2_ref[...], preferred_element_type=jnp.float32)
    h2 = jnp.dot(adj, support2, preferred_element_type=jnp.float32) + b2_ref[...]

    # ---- log_softmax over dim=1 (feature axis) --------------------------------
    m = jnp.max(h2, axis=1, keepdims=True)
    z = h2 - m
    lse = jnp.log(jnp.sum(jnp.exp(z), axis=1, keepdims=True))
    out_ref[...] = (z - lse).astype(out_ref.dtype)


def gcn_forward(x, adj, w1, b1, w2, b2, dropout_bits):
    n = x.shape[0]
    out_f = w2.shape[1]
    # Whole problem fits in VMEM at these sizes -> grid-less call, all operands
    # resident as full arrays, no pipeline / double-buffering machinery.
    return pl.pallas_call(
        gcn_kernel,
        out_shape=jax.ShapeDtypeStruct((n, out_f), jnp.float32),
    )(x, adj, w1, b1, w2, b2, dropout_bits)


if __name__ == "__main__":
    key = jax.random.PRNGKey(0)
    k_x, k_adj, k_w1, k_b1, k_w2, k_b2, k_drop = jax.random.split(key, 7)

    # deterministic synthetic inputs
    x = jax.random.normal(k_x, (N, IN_FEATURE), dtype=jnp.float32)
    # symmetric, row-normalized adjacency with self loops
    a = (jax.random.uniform(k_adj, (N, N)) < 0.2).astype(jnp.float32)
    a = jnp.maximum(a, a.T) + jnp.eye(N, dtype=jnp.float32)
    adj = a / jnp.sum(a, axis=1, keepdims=True)

    # deterministic parameter init (Glorot-uniform-like)
    def glorot(k, shape):
        lim = (6.0 / (shape[0] + shape[1])) ** 0.5
        return jax.random.uniform(k, shape, minval=-lim, maxval=lim,
                                  dtype=jnp.float32)

    w1 = glorot(k_w1, (IN_FEATURE, HIDDEN))
    b1 = jax.random.uniform(k_b1, (1, HIDDEN), minval=-0.1, maxval=0.1,
                            dtype=jnp.float32)
    w2 = glorot(k_w2, (HIDDEN, OUT_FEATURE))
    b2 = jax.random.uniform(k_b2, (1, OUT_FEATURE), minval=-0.1, maxval=0.1,
                            dtype=jnp.float32)

    # dropout randomness: deterministic uint32 bits (will not bit-match a
    # PyTorch RNG stream, but implements the same Bernoulli(1-p) keep mask).
    dropout_bits = jax.random.bits(k_drop, (N, HIDDEN), dtype=jnp.uint32)

    out = gcn_forward(x, adj, w1, b1, w2, b2, dropout_bits)
    out = jax.block_until_ready(out)

    assert out.shape == (N, OUT_FEATURE)
    # rows of log_softmax must exp-sum to ~1
    row_sums = jnp.sum(jnp.exp(out), axis=1)
    assert jnp.allclose(row_sums, 1.0, atol=1e-4), row_sums
    # quick sanity vs. a pure-JAX reference with the same dropout mask
    keep = (dropout_bits >= jnp.uint32(_KEEP_THRESHOLD)).astype(jnp.float32)
    h1_ref = adj @ (x @ w1) + b1
    h1_ref = jnp.maximum(h1_ref * keep * _INV_KEEP, 0.0)
    h2_ref = adj @ (h1_ref @ w2) + b2
    ref = jax.nn.log_softmax(h2_ref, axis=1)
    assert jnp.allclose(out, ref, atol=1e-4, rtol=1e-4)
    print("KERNEL_OK")
</pallas_src>

<mosaic_0001>
module attributes {stable_mosaic.version = 11 : i64} {
  func.func @gcn_kernel(%arg0: memref<32x16xf32, #tpu.memory_space<vmem>>, %arg1: memref<32x32xf32, #tpu.memory_space<vmem>>, %arg2: memref<16x32xf32, #tpu.memory_space<vmem>>, %arg3: memref<1x32xf32, #tpu.memory_space<vmem>>, %arg4: memref<32x8xf32, #tpu.memory_space<vmem>>, %arg5: memref<1x8xf32, #tpu.memory_space<vmem>>, %arg6: memref<32x32xi32, #tpu.memory_space<vmem>>, %arg7: memref<32x8xf32, #tpu.memory_space<vmem>>) attributes {dimension_semantics = [], scalar_prefetch = 0 : i64, scratch_operands = 0 : i64, tpu.core_type = #tpu.core_type<tc>} {
    %c0 = arith.constant 0 : index
    %c0_0 = arith.constant 0 : index
    %0 = vector.load %arg0[%c0, %c0_0] : memref<32x16xf32, #tpu.memory_space<vmem>>, vector<32x16xf32>
    %c0_1 = arith.constant 0 : index
    %c0_2 = arith.constant 0 : index
    %1 = vector.load %arg1[%c0_1, %c0_2] : memref<32x32xf32, #tpu.memory_space<vmem>>, vector<32x32xf32>
    %c0_3 = arith.constant 0 : index
    %c0_4 = arith.constant 0 : index
    %2 = vector.load %arg2[%c0_3, %c0_4] : memref<16x32xf32, #tpu.memory_space<vmem>>, vector<16x32xf32>
    %cst = arith.constant dense<0.000000e+00> : vector<32x32xf32>
    %3 = tpu.matmul %0, %2, %cst {dimension_numbers = #tpu.dot_dimension_numbers<[1], [0], [0], [1], [0, 0, 1, 1], [], []>} : vector<32x16xf32>, vector<16x32xf32>, vector<32x32xf32> -> vector<32x32xf32>
    %cst_5 = arith.constant dense<0.000000e+00> : vector<32x32xf32>
    %4 = tpu.matmul %1, %3, %cst_5 {dimension_numbers = #tpu.dot_dimension_numbers<[1], [0], [0], [1], [0, 0, 1, 1], [], []>} : vector<32x32xf32>, vector<32x32xf32>, vector<32x32xf32> -> vector<32x32xf32>
    %c0_6 = arith.constant 0 : index
    %c0_7 = arith.constant 0 : index
    %5 = vector.load %arg3[%c0_6, %c0_7] : memref<1x32xf32, #tpu.memory_space<vmem>>, vector<1x32xf32>
    %6 = vector.broadcast %5 : vector<1x32xf32> to vector<32x32xf32>
    %7 = arith.addf %4, %6 : vector<32x32xf32>
    %c0_8 = arith.constant 0 : index
    %c0_9 = arith.constant 0 : index
    %8 = vector.load %arg6[%c0_8, %c0_9] : memref<32x32xi32, #tpu.memory_space<vmem>>, vector<32x32xi32>
    %c-2147483648_i32 = arith.constant -2147483648 : i32
    %9 = vector.broadcast %c-2147483648_i32 : i32 to vector<32x32xi32>
    %10 = arith.cmpi uge, %8, %9 : vector<32x32xi32>
    %cst_10 = arith.constant 0.000000e+00 : f32
    %11 = vector.broadcast %cst_10 : f32 to vector<32x32xf32>
    %12 = arith.cmpf ogt, %7, %11 : vector<32x32xf32>
    %13 = arith.andi %10, %12 : vector<32x32xi1>
    %cst_11 = arith.constant 2.000000e+00 : f32
    %14 = vector.broadcast %cst_11 : f32 to vector<32x32xf32>
    %15 = arith.mulf %7, %14 : vector<32x32xf32>
    %cst_12 = arith.constant 0.000000e+00 : f32
    %16 = vector.broadcast %cst_12 : f32 to vector<32x32xf32>
    %17 = arith.select %13, %15, %16 : vector<32x32xi1>, vector<32x32xf32>
    %c0_13 = arith.constant 0 : index
    %c0_14 = arith.constant 0 : index
    %18 = vector.load %arg4[%c0_13, %c0_14] : memref<32x8xf32, #tpu.memory_space<vmem>>, vector<32x8xf32>
    %cst_15 = arith.constant dense<0.000000e+00> : vector<32x8xf32>
    %19 = tpu.matmul %17, %18, %cst_15 {dimension_numbers = #tpu.dot_dimension_numbers<[1], [0], [0], [1], [0, 0, 1, 1], [], []>} : vector<32x32xf32>, vector<32x8xf32>, vector<32x8xf32> -> vector<32x8xf32>
    %cst_16 = arith.constant dense<0.000000e+00> : vector<32x8xf32>
    %20 = tpu.matmul %1, %19, %cst_16 {dimension_numbers = #tpu.dot_dimension_numbers<[1], [0], [0], [1], [0, 0, 1, 1], [], []>} : vector<32x32xf32>, vector<32x8xf32>, vector<32x8xf32> -> vector<32x8xf32>
    %c0_17 = arith.constant 0 : index
    %c0_18 = arith.constant 0 : index
    %21 = vector.load %arg5[%c0_17, %c0_18] : memref<1x8xf32, #tpu.memory_space<vmem>>, vector<1x8xf32>
    %22 = vector.broadcast %21 : vector<1x8xf32> to vector<32x8xf32>
    %23 = arith.addf %20, %22 : vector<32x8xf32>
    %cst_19 = arith.constant dense<0xFF800000> : vector<32xf32>
    %24 = vector.multi_reduction <maximumf>, %23, %cst_19 [1] : vector<32x8xf32> to vector<32xf32>
    %25 = vector.shape_cast %24 : vector<32xf32> to vector<32x1xf32>
    %26 = vector.broadcast %25 : vector<32x1xf32> to vector<32x8xf32>
    %27 = arith.subf %23, %26 : vector<32x8xf32>
    %28 = math.exp %27 : vector<32x8xf32>
    %cst_20 = arith.constant dense<0.000000e+00> : vector<32xf32>
    %29 = vector.multi_reduction <add>, %28, %cst_20 [1] : vector<32x8xf32> to vector<32xf32>
    %30 = vector.shape_cast %29 : vector<32xf32> to vector<32x1xf32>
    %31 = math.log %30 : vector<32x1xf32>
    %32 = vector.broadcast %31 : vector<32x1xf32> to vector<32x8xf32>
    %33 = arith.subf %27, %32 : vector<32x8xf32>
    %c0_21 = arith.constant 0 : index
    %c0_22 = arith.constant 0 : index
    %34 = vector.load %arg7[%c0_21, %c0_22] : memref<32x8xf32, #tpu.memory_space<vmem>>, vector<32x8xf32>
    tpu.vector_store %arg7[%c0_21, %c0_22], %33 {strides = array<i32>} : memref<32x8xf32, #tpu.memory_space<vmem>>, vector<32x8xf32>,
    return
  }
}

</mosaic_0001>

<bundles_post_ra>
// kernel: tpu_custom_call.1
= control target key start
LH: loop header
LB: loop body
LE: loop exit
PB: predicated region body
PF: predicated region fallthrough
CT: control target
= control target key end

     0   :  { %vm36_vm0 = vcmask 130048   ;;  %vm141_vm1 = vcmask 261120   ;;  %vm456_vm14 = vcmask 64512   ;;  %s783_s2 = inlined_call_operand.vmem [shape: f32[16,32], index: 2, kind: input, shape index: {}]   ;;  %s784_s0 = inlined_call_operand.vmem [shape: f32[32,16], index: 0, kind: input, shape index: {}]   ;;  %s785_s1 = inlined_call_operand.vmem [shape: f32[32,32], index: 1, kind: input, shape index: {}]   ;;  %s786_s4 = inlined_call_operand.vmem [shape: f32[32,8], index: 4, kind: input, shape index: {}]   ;;  %s787_s3 = inlined_call_operand.vmem [shape: f32[1,32], index: 3, kind: input, shape index: {}]   ;;  %s788_s6 = inlined_call_operand.vmem [shape: u32[32,32], index: 6, kind: input, shape index: {}]   ;;  %s789_s5 = inlined_call_operand.vmem [shape: f32[1,8], index: 5, kind: input, shape index: {}]   ;;  %s790_s7 = inlined_call_operand.vmem [shape: f32[32,8], index: 7, kind: output, shape index: {}]  }
   0x1   :  { %v35_v0 = vld [vmem:[%s783_s2 + $0x8] sm:$0xff]  ;;  %v34_v1 = vld [vmem:[%s783_s2] sm:$0xff]  ;;  %v28_v4 = vld [vmem:[%s784_s0 + $0x10] sm:$0xff] }
   0x2   :  { %v26_v2 = vld [vmem:[%s784_s0] sm:$0xff]  ;;  %561 = vmatprep.subr.mxu0 %v35_v0  ;;  %v27_v3 = vld [vmem:[%s784_s0 + $0x8] sm:$0xff]  ;;  %v29_v5 = vld [vmem:[%s784_s0 + $0x18] sm:$0xff] }
   0x3   :  { %565 = vmatprep.mubr.msk.f32.mxu0 %vm36_vm0, %v26_v2  ;;  %562 = vmatpush3.msra.mxu0 %v35_v0  ;;  %v30_v6 = vld [vmem:[%s785_s1] sm:$0xff]  ;;  %v694_v11 = vld [vmem:[%s785_s1 + $0x8] sm:$0xff]  ;;  %v699_v12 = vld [vmem:[%s785_s1 + $0x10] sm:$0xff] }
   0x4   :  { %563 = vmatprep.subr.mxu0 %v34_v1  ;;  %579 = vmatprep.mubr.msk.f32.mxu1 %vm141_vm1, %v30_v6  ;;  %v708_v13 = vld [vmem:[%s785_s1 + $0x18] sm:$0xff]  ;;  %v265_v15 = vld [vmem:[%s786_s4 + $0x10] sm:$0xff]  ;;  %v264_v16 = vld [vmem:[%s786_s4 + $0x8] sm:$0xff] }
   0x5   :  { %564 = vmatpush3.msra.mxu0 %v34_v1  ;;  %v266_v14 = vld [vmem:[%s786_s4 + $0x18] sm:$0xff]  ;;  %v263_v17 = vld [vmem:[%s786_s4] sm:$0xff]  ;;  %v240_v19 = vld [vmem:[%s788_s6 + $0x8] sm:$0xff] }
   0x6   :  { %566 = vmatmul.mubr.msk.f32.vlgmr.msra.gmra.mxu0 %vm36_vm0, %v27_v3  ;;  %585 = vmatprep.subr.mxu0 %v266_v14  ;;  %v517_v18 = vld [vmem:[%s787_s3] ss:$0 sm:$0xff]  ;;  %vm244_vm2 = vcmp.ge.u32.totalorder %v240_v19, 2147483648  ;;  %v242_v25 = vld [vmem:[%s788_s6 + $0x18] sm:$0xff]  ;;  %v241_v28 = vld [vmem:[%s788_s6 + $0x10] sm:$0xff] }
   0x7   :  { %568 = vmatprep.mubr.msk.f32.mxu0 %vm36_vm0, %v28_v4  ;;  %586 = vmatpush3.msra.mxu0 %v266_v14  ;;  %v239_v21 = vld [vmem:[%s788_s6] sm:$0xff]  ;;  %vm246_vm8 = vcmp.ge.u32.totalorder %v242_v25, 2147483648  ;;  %vm245_vm10 = vcmp.ge.u32.totalorder %v241_v28, 2147483648 }
   0x8   :  { %587 = vmatprep.subr.mxu0 %v265_v15  ;;  %vm243_vm4 = vcmp.ge.u32.totalorder %v239_v21, 2147483648  ;;  %v526_v45 = vld [vmem:[%s789_s5] ss:$0 sm:$0xff] }
   0x9   :  { %588 = vmatpush3.msra.mxu0 %v265_v15 }
   0xa   :  { %569 = vmatmul.mubr.msk.f32.gmra.mxu0 %vm36_vm0, %v29_v5  ;;  %589 = vmatprep.subr.mxu0 %v264_v16 }
   0xb   :  { %590 = vmatpush3.msra.mxu0 %v264_v16 }
   0xc   :  { %591 = vmatprep.subr.mxu0 %v263_v17 }
   0xd   :  { %592 = vmatpush3.msra.mxu0 %v263_v17 }
  0xc6   :  { %v567_v7 = vpop.f32.mrf.mxu0 }
  0xc8   :  { %v115_v8 = vpop.f32.mrf.mxu0 }
  0xca   :  { %v570_v9 = vpop.f32.mrf.mxu0 }
  0xcb   :  { %571 = vmatprep.subr.mxu1 %v570_v9 }
  0xcc   :  { %v125_v10 = vpop.f32.mrf.mxu0  ;;  %572 = vmatpush3.msra.mxu1 %v570_v9 }
  0xcd   :  { %573 = vmatprep.subr.mxu1 %v125_v10 }
  0xce   :  { %574 = vmatpush3.msra.mxu1 %v125_v10 }
  0xcf   :  { %575 = vmatprep.subr.mxu1 %v567_v7 }
  0xd0   :  { %576 = vmatpush3.msra.mxu1 %v567_v7 }
  0xd1   :  { %577 = vmatprep.subr.mxu1 %v115_v8 }
  0xd2   :  { %578 = vmatpush3.msra.mxu1 %v115_v8 }
  0xd3   :  { %580 = vmatmul.mubr.msk.f32.vlgmr.msra.gmra.mxu1 %vm141_vm1, %v694_v11 }
  0xd4   :  { %582 = vmatprep.mubr.msk.f32.mxu1 %vm141_vm1, %v699_v12 }
  0xd7   :  { %583 = vmatmul.mubr.msk.f32.gmra.mxu1 %vm141_vm1, %v708_v13 }
  0xd8   :  { %607 = vmatprep.mubr.msk.f32.mxu1 %vm141_vm1, %v30_v6 }
 0x193   :  { %v581_v20 = vpop.f32.mrf.mxu1 }
 0x194   :  { %v226_v22 = vadd.f32 %v581_v20, %v517_v18 }
 0x195   :  { %v220_v23 = vpop.f32.mrf.mxu1 }
 0x196   :  { %vm248_vm3 = vcmp.gt.f32.partialorder %v226_v22, 0.0  ;;  %v221_v24 = vadd.f32 %v517_v18, %v220_v23  ;;  %v256_v26 = vmul.f32 2.0, %v226_v22 }
 0x197   :  { %v584_v27 = vpop.f32.mrf.mxu1  ;;  %vm740_vm5 = vmand %vm244_vm2, %vm248_vm3 }
 0x198   :  { %vm247_vm6 = vcmp.gt.f32.partialorder %v221_v24, 0.0  ;;  %v255_v30 = vmul.f32 2.0, %v221_v24  ;;  %v236_v31 = vadd.f32 %v584_v27, %v517_v18  ;;  %v260_v35 = vsel %vm740_vm5, %v256_v26, 0.0 }
 0x199   :  { %vm251_vm7 = vmand %vm243_vm4, %vm247_vm6  ;;  %v230_v32 = vpop.f32.mrf.mxu1 }
 0x19a   :  { %vm250_vm9 = vcmp.gt.f32.partialorder %v236_v31, 0.0  ;;  %v231_v33 = vadd.f32 %v517_v18, %v230_v32  ;;  %v259_v34 = vsel %vm251_vm7, %v255_v30, 0.0  ;;  %v258_v36 = vmul.f32 2.0, %v236_v31 }
 0x19b   :  { %593 = vmatprep.mubr.msk.f32.mxu0 %vm141_vm1, %v259_v34  ;;  %vm254_vm11 = vmand %vm246_vm8, %vm250_vm9 }
 0x19c   :  { %vm249_vm12 = vcmp.gt.f32.partialorder %v231_v33, 0.0  ;;  %v257_v37 = vmul.f32 2.0, %v231_v33  ;;  %594 = vmatmul.mubr.msk.f32.vlgmr.msra.gmra.mxu0 %vm141_vm1, %v260_v35  ;;  %v262_v39 = vsel %vm254_vm11, %v258_v36, 0.0 }
 0x19d   :  { %vm253_vm13 = vmand %vm245_vm10, %vm249_vm12 }
 0x19e   :  { %v261_v38 = vsel %vm253_vm13, %v257_v37, 0.0 }
 0x19f   :  { %596 = vmatprep.mubr.msk.f32.mxu0 %vm141_vm1, %v261_v38 }
 0x1a0   :  { %597 = vmatmul.mubr.msk.f32.gmra.mxu0 %vm141_vm1, %v262_v39 }
 0x25c   :  { %v595_v40 = vpop.f32.mrf.mxu0 }
 0x25e   :  { %v345_v41 = vpop.f32.mrf.mxu0 }
 0x260   :  { %v598_v42 = vpop.f32.mrf.mxu0 }
 0x261   :  { %599 = vmatprep.subr.mxu1 %v598_v42 }
 0x262   :  { %v355_v43 = vpop.f32.mrf.mxu0  ;;  %600 = vmatpush3.msra.mxu1 %v598_v42 }
 0x263   :  { %601 = vmatprep.subr.mxu1 %v355_v43 }
 0x264   :  { %602 = vmatpush3.msra.mxu1 %v355_v43 }
 0x265   :  { %603 = vmatprep.subr.mxu1 %v595_v40 }
 0x266   :  { %604 = vmatpush3.msra.mxu1 %v595_v40 }
 0x267   :  { %605 = vmatprep.subr.mxu1 %v345_v41 }
 0x268   :  { %606 = vmatpush3.msra.mxu1 %v345_v41 }
 0x269   :  { %608 = vmatmul.mubr.msk.f32.vlgmr.msra.gmra.mxu1 %vm141_vm1, %v694_v11 }
 0x26a   :  { %610 = vmatprep.mubr.msk.f32.mxu1 %vm141_vm1, %v699_v12 }
 0x26d   :  { %611 = vmatmul.mubr.msk.f32.gmra.mxu1 %vm141_vm1, %v708_v13 }
 0x329   :  { %v609_v44 = vpop.f32.mrf.mxu1 }
 0x32a   :  { %v443_v49 = vadd.f32 %v609_v44, %v526_v45 }
 0x32b   :  { %v437_v46 = vpop.f32.mrf.mxu1 }
 0x32c   :  { %v438_v47 = vadd.f32 %v526_v45, %v437_v46  ;;  %v460_v55 = vsel %vm456_vm14, %v443_v49, -inf }
 0x32d   :  { %v612_v48 = vpop.f32.mrf.mxu1 }
 0x32e   :  { %v457_v50 = vsel %vm456_vm14, %v438_v47, -inf  ;;  %v453_v53 = vadd.f32 %v612_v48, %v526_v45 }
 0x32f   :  { %v447_v51 = vpop.f32.mrf.mxu1  ;;  %458 = vmax.xlane.f32.xlu0 %v457_v50 }
 0x330   :  { %v448_v52 = vadd.f32 %v526_v45, %v447_v51  ;;  %v466_v56 = vsel %vm456_vm14, %v453_v53, -inf }
 0x332   :  { %v463_v54 = vsel %vm456_vm14, %v448_v52, -inf }
 0x333   :  { %464 = vmax.xlane.f32.xlu1 %v463_v54  ;;  %461 = vmax.xlane.f32.xlu0 %v460_v55 }
 0x337   :  { %467 = vmax.xlane.f32.xlu1 %v466_v56 }
 0x3b8   :  { %v459_v57 = vpop.xlane.xlu0 %458 }
 0x3b9   :  { %v469_v58 = vsub.f32 %v438_v47, %v459_v57 }
 0x3bb   :  { %v473_v59 = vmul.f32 1.442695, %v469_v58 }
 0x3bc   :  { %v465_v60 = vpop.xlane.xlu1 %464  ;;  %v462_v61 = vpop.xlane.xlu0 %461 }
 0x3bd   :  { %613 = vpow2.f32 %v473_v59  ;;  %v471_v62 = vsub.f32 %v448_v52, %v465_v60  ;;  %v470_v63 = vsub.f32 %v443_v49, %v462_v61 }
 0x3bf   :  { %v477_v0 = vmul.f32 1.442695, %v471_v62  ;;  %v475_v1 = vmul.f32 1.442695, %v470_v63 }
 0x3c0   :  { %v468_v2 = vpop.xlane.xlu1 %467 }
 0x3c1   :  { %615 = vpow2.f32 %v477_v0  ;;  %v472_v3 = vsub.f32 %v453_v53, %v468_v2 }
 0x3c2   :  { %617 = vpow2.f32 %v475_v1 }
 0x3c3   :  { %v479_v4 = vmul.f32 1.442695, %v472_v3 }
 0x3c5   :  { %619 = vpow2.f32 %v479_v4 }
 0x3ca   :  { %v614_v5 = vpop.eup %613 }
 0x3cb   :  { %v481_v6 = vsel %vm456_vm14, %v614_v5, 0.0 }
 0x3cc   :  { %482 = vadd.xlane.f32.xlu0 %v481_v6 }
 0x3ce   :  { %v616_v7 = vpop.eup %615 }
 0x3cf   :  { %v618_v8 = vpop.eup %617  ;;  %v487_v9 = vsel %vm456_vm14, %v616_v7, 0.0 }
 0x3d0   :  { %488 = vadd.xlane.f32.xlu0 %v487_v9  ;;  %v484_v10 = vsel %vm456_vm14, %v618_v8, 0.0 }
 0x3d1   :  { %485 = vadd.xlane.f32.xlu1 %v484_v10 }
 0x3d2   :  { %v620_v11 = vpop.eup %619 }
 0x3d3   :  { %v490_v12 = vsel %vm456_vm14, %v620_v11, 0.0 }
 0x3d5   :  { %491 = vadd.xlane.f32.xlu1 %v490_v12 }
 0x455   :  { %v483_v13 = vpop.xlane.xlu0 %482 }
 0x456   :  { %621 = vlog2.f32 %v483_v13 }
 0x459   :  { %v489_v14 = vpop.xlane.xlu0 %488 }
 0x45a   :  { %v486_v15 = vpop.xlane.xlu1 %485  ;;  %623 = vlog2.f32 %v489_v14 }
 0x45b   :  { %625 = vlog2.f32 %v486_v15 }
 0x45e   :  { %v492_v16 = vpop.xlane.xlu1 %491 }
 0x45f   :  { %627 = vlog2.f32 %v492_v16 }
 0x463   :  { %v622_v17 = vpop.eup %621 }
 0x464   :  { %v494_v18 = vmul.f32 0.6931472, %v622_v17 }
 0x466   :  { %v501_v19 = vsub.f32 %v469_v58, %v494_v18 }
 0x467   :  { %v624_v20 = vpop.eup %623 }
 0x468   :  { %v626_v21 = vpop.eup %625  ;;  %505 = vst.msk [vmem:[%s790_s7] sm:$0xff] %vm456_vm14, %v501_v19  ;;  %v498_v22 = vmul.f32 0.6931472, %v624_v20 }
 0x469   :  { %v496_v23 = vmul.f32 0.6931472, %v626_v21 }
 0x46a   :  { %v503_v24 = vsub.f32 %v471_v62, %v498_v22 }
 0x46b   :  { %v502_v25 = vsub.f32 %v470_v63, %v496_v23 }
 0x46c   :  { %v628_v26 = vpop.eup %627  ;;  %507 = vst.msk [vmem:[%s790_s7 + $0x10] sm:$0xff] %vm456_vm14, %v503_v24 }
 0x46d   :  { %506 = vst.msk [vmem:[%s790_s7 + $0x8] sm:$0xff] %vm456_vm14, %v502_v25  ;;  %v500_v27 = vmul.f32 0.6931472, %v628_v26 }
 0x46f   :  { %v504_v28 = vsub.f32 %v472_v3, %v500_v27 }
 0x471   :  { %508 = vst.msk [vmem:[%s790_s7 + $0x18] sm:$0xff] %vm456_vm14, %v504_v28 }

</bundles_post_ra>
